<compile_context>
chip_gen: v7x
topology: tpu7x:2x2x1
jax: 0.10.0
libtpu: 0.0.40
codegen_flags: <defaults>
</compile_context>

<pallas_src>
import jax
import jax.numpy as jnp
from jax.experimental import pallas as pl
from jax.experimental.pallas import tpu as pltpu

_MIB = 1024 * 1024


# --------------------------------------------------------------------------
# Kernels
# --------------------------------------------------------------------------
def _broadcast_rows_kernel(emb_ref, out_ref):
    # emb_ref: (1, TLH) resident tile; out_ref: (TB, TLH) lane-dense slab.
    # Sublane broadcast of one row -> TB rows; the only real cost is the store
    # and the writeback DMA (fill is hidden under the previous block's DMA).
    out_ref[...] = jnp.broadcast_to(emb_ref[...], out_ref.shape)


def _broadcast_mid_kernel(emb_ref, out_ref):
    # emb_ref: (TL, 1, H) resident tile; out_ref: (TL, TB, H).
    # Broadcast along the middle (batch) dim -> direct seq-first layout.
    out_ref[...] = jnp.broadcast_to(emb_ref[...], out_ref.shape)


# --------------------------------------------------------------------------
# Tiling helpers
# --------------------------------------------------------------------------
def _vmem_budget():
    """(target_block_bytes, vmem_limit_bytes) sized per TPU generation."""
    phys = None
    try:
        phys = getattr(pltpu.get_tpu_info(), "vmem_capacity_bytes", None)
    except Exception:
        phys = None
    if phys is None:
        phys = 64 * _MIB              # conservative (v7x-sized) fallback
    if phys >= 96 * _MIB:             # v5e / v6e: 128 MiB physical VMEM
        return 24 * _MIB, 64 * _MIB
    # v7x: 64 MiB physical VMEM per TensorCore
    return 16 * _MIB, 40 * _MIB


def _sublane_pack(dtype):
    """Sublane packing factor: 8 for 32-bit, 16 for 16-bit, 32 for 8-bit."""
    return max(8, 32 // jnp.dtype(dtype).itemsize)


def _choose_tiles_2d(bs, lh, itemsize, pack, target_bytes):
    """(tb, tlh) for the (bs, L*H) flattened layout, block bytes <= target."""
    row_bytes = max(lh * itemsize, 1)
    tb = target_bytes // row_bytes
    if tb >= bs:
        return bs, lh                          # whole output in one block
    if tb >= pack:
        return (tb // pack) * pack, lh         # block over batch only
    # A single row busts the budget: block the flattened L*H axis too.
    tb = min(pack, bs)
    tlh = max(128, (target_bytes // (tb * itemsize)) // 128 * 128)
    return tb, min(tlh, lh)


def _choose_tiles_3d(L, bs, H, itemsize, pack, target_bytes):
    """(tl, tb) for the (L, bs, H) seq-first layout, block bytes <= target."""
    row_bytes = max(L * H * itemsize, 1)       # full L, one batch element
    tb = target_bytes // row_bytes
    if tb >= bs:
        return L, bs
    if tb >= pack:
        return L, (tb // pack) * pack
    tb = min(pack, bs)
    tl = max(1, target_bytes // max(tb * H * itemsize, 1))
    return min(tl, L), tb


# --------------------------------------------------------------------------
# pallas_call builders
# --------------------------------------------------------------------------
def _expand_batch_first(emb, bs, target_bytes, vmem_limit):
    """(bs, L, H) = emb broadcast over a leading batch dim."""
    L, H = emb.shape
    LH = L * H
    itemsize = jnp.dtype(emb.dtype).itemsize
    pack = _sublane_pack(emb.dtype)

    # Lane-dense layout: trailing dim L*H (full-array dim, so the (8,128)
    # block constraint is always satisfiable).
    emb_flat = emb.reshape(1, LH)
    tb, tlh = _choose_tiles_2d(bs, LH, itemsize, pack, target_bytes)
    # LH axis OUTER so the input tile is only re-fetched when the LH block
    # changes; batch blocks are the fast-moving inner axis.
    grid = (pl.cdiv(LH, tlh), pl.cdiv(bs, tb))

    out_flat = pl.pallas_call(
        _broadcast_rows_kernel,
        out_shape=jax.ShapeDtypeStruct((bs, LH), emb.dtype),
        grid_spec=pltpu.PrefetchScalarGridSpec(
            num_scalar_prefetch=0,
            grid=grid,
            in_specs=[pl.BlockSpec((1, tlh), lambda c, b: (0, c))],
            out_specs=pl.BlockSpec((tb, tlh), lambda c, b: (b, c)),
        ),
        compiler_params=pltpu.CompilerParams(
            dimension_semantics=("parallel", "parallel"),
            vmem_limit_bytes=vmem_limit,
        ),
        cost_estimate=pl.CostEstimate(
            flops=0,
            transcendentals=0,
            bytes_accessed=bs * LH * itemsize + grid[0] * tlh * itemsize),
    )(emb_flat)
    return out_flat.reshape(bs, L, H)


def _expand_seq_first(emb, bs, target_bytes, vmem_limit):
    """(L, bs, H) produced directly in the kernel (requires H % 128 == 0)."""
    L, H = emb.shape
    itemsize = jnp.dtype(emb.dtype).itemsize
    pack = _sublane_pack(emb.dtype)

    emb3 = emb.reshape(L, 1, H)
    tl, tb = _choose_tiles_3d(L, bs, H, itemsize, pack, target_bytes)
    grid = (pl.cdiv(L, tl), pl.cdiv(bs, tb))

    out = pl.pallas_call(
        _broadcast_mid_kernel,
        out_shape=jax.ShapeDtypeStruct((L, bs, H), emb.dtype),
        grid_spec=pltpu.PrefetchScalarGridSpec(
            num_scalar_prefetch=0,
            grid=grid,
            in_specs=[pl.BlockSpec((tl, 1, H), lambda l, b: (l, 0, 0))],
            out_specs=pl.BlockSpec((tl, tb, H), lambda l, b: (l, b, 0)),
        ),
        compiler_params=pltpu.CompilerParams(
            dimension_semantics=("parallel", "parallel"),
            vmem_limit_bytes=vmem_limit,
        ),
        cost_estimate=pl.CostEstimate(
            flops=0,
            transcendentals=0,
            bytes_accessed=L * bs * H * itemsize + grid[0] * tl * H * itemsize),
    )(emb3)
    return out


def _expand_embeddings(emb, bs, batch_first, *, force_pallas=False):
    """emb broadcast over batch: (bs, L, H) if batch_first else (L, bs, H)."""
    L, H = emb.shape
    itemsize = jnp.dtype(emb.dtype).itemsize
    out_bytes = bs * L * H * itemsize

    # Tiny outputs: the pallas_call fixed overhead dwarfs the copy; let XLA
    # do a (possibly lazily fused) broadcast instead.
    if out_bytes < _MIB and not force_pallas:
        if batch_first:
            return jnp.broadcast_to(emb[None, :, :], (bs, L, H))
        return jnp.broadcast_to(emb[:, None, :], (L, bs, H))

    target_bytes, vmem_limit = _vmem_budget()

    if batch_first:
        return _expand_batch_first(emb, bs, target_bytes, vmem_limit)

    if H % 128 == 0:
        # Lane-dense direct seq-first stores: no extra transpose pass.
        return _expand_seq_first(emb, bs, target_bytes, vmem_limit)

    # H not lane-aligned (e.g. tiny demo hidden=32): produce batch-first and
    # transpose in the wrapper, where XLA can fuse it with the consumer.
    out = _expand_batch_first(emb, bs, target_bytes, vmem_limit)
    return jnp.transpose(out, (1, 0, 2))


# --------------------------------------------------------------------------
# Module
# --------------------------------------------------------------------------
class DeepPromptPallas:
    """JAX/Pallas port of DeepPrompt (parameters created in __init__)."""

    def __init__(self, input_prompt_len, target_prompt_len, hidden_size,
                 target_deep_prompt=True, share_deep_prompt=False,
                 dtype=jnp.float32, seed=0):
        key = jax.random.PRNGKey(seed)
        k_in, k_tgt = jax.random.split(key)
        # nn.Embedding default init is N(0, 1)
        self.embedding = jax.random.normal(
            k_in, (input_prompt_len, hidden_size), dtype=dtype)
        self.target_prompt = target_deep_prompt and (not share_deep_prompt)
        if self.target_prompt:
            self.target_embedding = jax.random.normal(
                k_tgt, (target_prompt_len, hidden_size), dtype=dtype)
        else:
            self.target_embedding = None

    def __call__(self, x, batch_first=False, data_type=None,
                 force_pallas=False, **kwargs):
        if data_type == "target" and self.target_prompt:
            emb = self.target_embedding
        else:
            emb = self.embedding
        bs = x.shape[0] if batch_first else x.shape[1]
        return _expand_embeddings(emb, bs, batch_first,
                                  force_pallas=force_pallas)


if __name__ == "__main__":
    # Small shapes consistent with the module:
    #   hidden=32, input prompt length=8, target prompt length=8, batch=2
    HIDDEN = 32
    IN_LEN = 8
    TGT_LEN = 8
    BS = 2
    SEQ = 5

    module = DeepPromptPallas(IN_LEN, TGT_LEN, HIDDEN, seed=0)

    key = jax.random.PRNGKey(0)
    # x's values are unused by forward; only its batch-dim matters.
    x_batch_first = jax.random.normal(key, (BS, SEQ, HIDDEN), dtype=jnp.float32)
    x_seq_first = jnp.transpose(x_batch_first, (1, 0, 2))

    # 1) batch_first=True path, default ("input") prompt, forced Pallas path.
    out_bf = module(x_batch_first, batch_first=True, force_pallas=True)
    out_bf = jax.block_until_ready(out_bf)
    assert out_bf.shape == (BS, IN_LEN, HIDDEN)
    ref_bf = jnp.broadcast_to(module.embedding[None, :, :],
                              (BS, IN_LEN, HIDDEN))
    assert jnp.allclose(out_bf, ref_bf)

    # 2) batch_first=False path with target prompt (H=32 not lane-aligned ->
    #    batch-first kernel + wrapper transpose fallback), forced Pallas path.
    out_sf = module(x_seq_first, batch_first=False, data_type="target",
                    force_pallas=True)
    out_sf = jax.block_until_ready(out_sf)
    assert out_sf.shape == (TGT_LEN, BS, HIDDEN)
    ref_sf = jnp.broadcast_to(module.target_embedding[:, None, :],
                              (TGT_LEN, BS, HIDDEN))
    assert jnp.allclose(out_sf, ref_sf)

    # 3) lane-aligned hidden (H=128) exercises the direct seq-first kernel.
    HIDDEN2 = 128
    module2 = DeepPromptPallas(IN_LEN, TGT_LEN, HIDDEN2, seed=0)
    x2_seq_first = jax.random.normal(jax.random.PRNGKey(0),
                                     (SEQ, BS, HIDDEN2), dtype=jnp.float32)
    out2 = module2(x2_seq_first, batch_first=False, force_pallas=True)
    out2 = jax.block_until_ready(out2)
    assert out2.shape == (IN_LEN, BS, HIDDEN2)
    ref2 = jnp.broadcast_to(module2.embedding[:, None, :],
                            (IN_LEN, BS, HIDDEN2))
    assert jnp.allclose(out2, ref2)

    # 4) un-forced tiny-output fast path (pure XLA broadcast) still matches.
    out_fast = module(x_batch_first, batch_first=True)
    out_fast = jax.block_until_ready(out_fast)
    assert jnp.allclose(out_fast, ref_bf)

    print("KERNEL_OK")
</pallas_src>

<mosaic_0001>
module attributes {stable_mosaic.version = 11 : i64} {
  func.func @_broadcast_rows_kernel(%arg0: i32, %arg1: i32, %arg2: memref<1x256xf32, #tpu.memory_space<vmem>>, %arg3: memref<2x256xf32, #tpu.memory_space<vmem>>) attributes {dimension_semantics = [#tpu.dimension_semantics<parallel>, #tpu.dimension_semantics<parallel>], iteration_bounds = array<i64: 1, 1>, scalar_prefetch = 0 : i64, scratch_operands = 0 : i64, tpu.core_type = #tpu.core_type<tc>, window_params = [{transform_indices = @transform_0, window_bounds = array<i64: 1, 256>}, {transform_indices = @transform_1, window_bounds = array<i64: 2, 256>}]} {
    %c0 = arith.constant 0 : index
    %c0_0 = arith.constant 0 : index
    %0 = vector.load %arg2[%c0, %c0_0] : memref<1x256xf32, #tpu.memory_space<vmem>>, vector<1x256xf32>
    %1 = vector.shape_cast %0 : vector<1x256xf32> to vector<1x256xf32>
    %2 = vector.broadcast %1 : vector<1x256xf32> to vector<2x256xf32>
    %c0_1 = arith.constant 0 : index
    %c0_2 = arith.constant 0 : index
    %3 = vector.load %arg3[%c0_1, %c0_2] : memref<2x256xf32, #tpu.memory_space<vmem>>, vector<2x256xf32>
    tpu.vector_store %arg3[%c0_1, %c0_2], %2 {strides = array<i32>} : memref<2x256xf32, #tpu.memory_space<vmem>>, vector<2x256xf32>,
    return
  }
  func.func @transform_0(%arg0: i32, %arg1: i32) -> (i32, i32) {
    %c0_i32 = arith.constant 0 : i32
    %c0_i32_0 = arith.constant 0 : i32
    return %c0_i32, %arg0 : i32, i32
  }
  func.func @transform_1(%arg0: i32, %arg1: i32) -> (i32, i32) {
    %c0_i32 = arith.constant 0 : i32
    return %arg1, %arg0 : i32, i32
  }
}

</mosaic_0001>

<bundles_post_ra>
// kernel: tpu_custom_call.1
= control target key start
LH: loop header
LB: loop body
LE: loop exit
PB: predicated region body
PF: predicated region fallthrough
CT: control target
= control target key end

     0   :  { %6 = vsyncpa [#allocation3], 0  ;;  %s143_s0 = inlined_call_operand.hbm [shape: f32[1,256], index: 0, kind: input, shape index: {}]   ;;  %s144_s1 = inlined_call_operand.hbm [shape: f32[2,256], index: 1, kind: output, shape index: {}]  }
   0x1   :  { %7 = vsyncpa [#allocation4], 0  ;;  %s107_s6 = smov [#allocation2]   ;;  %s59_s10 = scalar_lea.hbm %s143_s0, 32 }
   0x2   :  { %s14_s7 = sshll.u32 %s107_s6, 4  ;;  %p60_p0 = scmp.ne.s32.totalorder %s143_s0, %s59_s10  ;;  %s15_s7 = int_to_ptr.vmem [resolvable:$true] %s14_s7 }
   0x3   :  { %p63_p1 = scmp.lt.u32.totalorder %s59_s10, %s143_s0 }
   0x5   :  { %p65_p2 = pnand %p63_p1, %p60_p0 }
   0x7   :  { %68 = shalt.err (!%p65_p2)
}
   0x8   :  { %s69_s15 = scalar_lea.vmem %s15_s7, 32  ;;  %p74_p4 = scmp.lt.s32.totalorder %s15_s7, %s15_s7 }
   0x9   :  { %p70_p3 = scmp.ne.s32.totalorder %s15_s7, %s69_s15  ;;  %p75_p5 = scmp.lt.s32.totalorder %s69_s15, %s69_s15 }
   0xb   :  { %p76_p6 = por %p75_p5, %p74_p4 }
   0xd   :  { %p77_p7 = pnand %p76_p6, %p70_p3 }
   0xf   :  { %80 = shalt.err (!%p77_p7)
}
  0x10   :  { %17 = dma.hbm_to_vmem [thread:$0]  %s143_s0, 32, %s15_s7, [#allocation3]  }
  0x11   :  { %103 = dma.done.wait [#allocation3], 32  }
  0x12   :  { %104 = vsyncadd [#allocation3], 4294967264  ;;  %v23_v0 = vlaneseq  ;;  %v21_v4 = vld [vmem:[#allocation2] sm:$0x3]  ;;  %s108_s18 = smov [#allocation5]  }
  0x13   :  { %s47_s19 = sshll.u32 %s108_s18, 4  ;;  %s48_s19 = int_to_ptr.vmem [resolvable:$true] %s47_s19 }
  0x14   :  { %v24_v1 = vshrl.u32 %v23_v0, 7  ;;  %s81_s20 = scalar_lea.vmem %s48_s19, 64  ;;  %p86_p9 = scmp.lt.s32.totalorder %s48_s19, %s48_s19 }
  0x15   :  { %p82_p8 = scmp.ne.s32.totalorder %s48_s19, %s81_s20  ;;  %p87_p10 = scmp.lt.s32.totalorder %s81_s20, %s81_s20 }
  0x16   :  { %v25_v2 = vsub.s32 0, %v24_v1  ;;  %v29_v3 = vsub.s32 1, %v24_v1 }
  0x17   :  { %p88_p11 = por %p87_p10, %p86_p9 }
  0x18   :  { %v26_v5 = vrot.slane %v21_v4, %v25_v2  ;;  %v30_v6 = vrot.slane %v21_v4, %v29_v3 }
  0x19   :  { %p89_p12 = pnand %p88_p11, %p82_p8 }
  0x1a   :  { %v31_v7 = vcombine.low %v26_v5, %v30_v6 }
  0x1c   :  { %56 = vst.sshfl [vmem:[#allocation5] sm:$0x33 pattern:$0x76325410] %v31_v7 }
  0x1d   :  { %92 = shalt.err (!%p89_p12)
}
  0x1e   :  { %s93_s22 = scalar_lea.hbm %s144_s1, 64 }
  0x1f   :  { %p94_p13 = scmp.ne.s32.totalorder %s144_s1, %s93_s22  ;;  %p97_p0 = scmp.lt.u32.totalorder %s93_s22, %s144_s1 }
  0x21   :  { %p99_p1 = pnand %p97_p0, %p94_p13 }
  0x23   :  { %102 = shalt.err (!%p99_p1)
}
  0x24   :  { %50 = dma.vmem_to_hbm [thread:$0]  %s48_s19, 64, %s144_s1, [#allocation4]  }
  0x25   :  { %105 = dma.done.wait [#allocation4], 64  }
  0x26   :  { %106 = vsyncadd [#allocation4], 4294967232 }
  0x27   :  { %54 = vsyncpa [#allocation3], 1 }
  0x28   :  { %55 = vsyncpa [#allocation4], 1 }

</bundles_post_ra>
